<compile_context>
chip_gen: v7x
topology: tpu7x:2x2x1
jax: 0.10.0
libtpu: 0.0.40
codegen_flags: <defaults>
</compile_context>

<pallas_src>
import jax
import jax.numpy as jnp
from jax.experimental import pallas as pl
from jax.experimental.pallas import tpu as pltpu


def _critic_kernel(xs_ref, xa_ref, w1s_ref, w1a_ref, b1_ref,
                   w2_ref, b2_ref, w3t_ref, b3_ref, q_ref):
    # fc1 as a split matmul (state part + actions part) -> no wrapper-side concat.
    h1 = (jnp.dot(xs_ref[...], w1s_ref[...], preferred_element_type=jnp.float32)
          + jnp.dot(xa_ref[...], w1a_ref[...], preferred_element_type=jnp.float32)
          + b1_ref[...])
    h1 = jnp.maximum(h1, 0.0)                                   # relu(fc1), f32 on VPU

    h2 = jnp.dot(h1.astype(w2_ref.dtype), w2_ref[...],
                 preferred_element_type=jnp.float32) + b2_ref[...]
    h2 = jnp.maximum(h2, 0.0)                                   # relu(fc2), f32 on VPU

    # fc3 as an NT matmul: (1, H) x (TB, H)^T -> (1, TB), lane-dense output row.
    q = jax.lax.dot_general(
        w3t_ref[...], h2.astype(w3t_ref.dtype),
        dimension_numbers=(((1,), (1,)), ((), ())),
        preferred_element_type=jnp.float32) + b3_ref[...]
    q_ref[...] = q[None].astype(q_ref.dtype)                    # (1, 1, TB)


def _nbytes(a):
    return int(a.size) * a.dtype.itemsize


def maddpg_critic_forward(inputs, actions, params, *, input_shape, n_actions, n_agents,
                          hidden_state=None, mxu_dtype=jnp.bfloat16, tile_rows=1024):
    """Mirrors MADDPGCritic.forward: returns (q, hidden_state)."""
    state_dim = input_shape - n_actions * n_agents
    act_dim = n_actions * n_agents

    if actions is not None:
        x_state = inputs.reshape(-1, state_dim)
        x_act = actions.reshape(-1, act_dim)
    else:
        flat = inputs.reshape(-1, input_shape)
        x_state = flat[:, :state_dim]
        x_act = flat[:, state_dim:]

    w1, b1, w2, b2, w3, b3 = params
    hidden = w1.shape[1]

    # Split fc1 weight (state/actions halves); transpose fc3 for the lane-dense row.
    w1s = w1[:state_dim].astype(mxu_dtype)          # (state_dim, H)
    w1a = w1[state_dim:].astype(mxu_dtype)          # (act_dim,   H)
    w2c = w2.astype(mxu_dtype)                      # (H, H)
    w3t = w3.T.astype(mxu_dtype)                    # (1, H)
    b1 = b1.reshape(1, hidden).astype(jnp.float32)
    b2 = b2.reshape(1, hidden).astype(jnp.float32)
    b3 = b3.reshape(1, 1).astype(jnp.float32)

    xs = x_state.astype(mxu_dtype)
    xa = x_act.astype(mxu_dtype)
    B = xs.shape[0]

    # Batch tile: large to amortize ~0.35us/step grid overhead, 16-row aligned (bf16).
    if B >= tile_rows:
        tb = tile_rows
    else:
        tb = max(16, ((B + 15) // 16) * 16)
    num_tiles = pl.cdiv(B, tb)
    b_pad = num_tiles * tb
    if b_pad != B:
        xs = jnp.pad(xs, ((0, b_pad - B), (0, 0)))
        xa = jnp.pad(xa, ((0, b_pad - B), (0, 0)))

    cost = pl.CostEstimate(
        flops=2 * b_pad * (input_shape * hidden + hidden * hidden + hidden),
        transcendentals=0,
        bytes_accessed=(_nbytes(xs) + _nbytes(xa) + _nbytes(w1s) + _nbytes(w1a)
                        + _nbytes(w2c) + _nbytes(w3t)
                        + _nbytes(b1) + _nbytes(b2) + _nbytes(b3)
                        + num_tiles * tb * 4),
    )

    q_tiles = pl.pallas_call(
        _critic_kernel,
        out_shape=jax.ShapeDtypeStruct((num_tiles, 1, tb), jnp.float32),
        grid=(num_tiles,),
        in_specs=[
            # batch-tiled activations
            pl.BlockSpec((tb, state_dim), lambda i: (i, 0)),
            pl.BlockSpec((tb, act_dim), lambda i: (i, 0)),
            # weights/biases: constant block index -> DMA'd once, resident across steps
            pl.BlockSpec((state_dim, hidden), lambda i: (0, 0)),
            pl.BlockSpec((act_dim, hidden), lambda i: (0, 0)),
            pl.BlockSpec((1, hidden), lambda i: (0, 0)),
            pl.BlockSpec((hidden, hidden), lambda i: (0, 0)),
            pl.BlockSpec((1, hidden), lambda i: (0, 0)),
            pl.BlockSpec((1, hidden), lambda i: (0, 0)),
            pl.BlockSpec((1, 1), lambda i: (0, 0)),
        ],
        out_specs=pl.BlockSpec((1, 1, tb), lambda i: (i, 0, 0)),
        compiler_params=pltpu.CompilerParams(dimension_semantics=("parallel",)),
        cost_estimate=cost,
    )(xs, xa, w1s, w1a, b1, w2c, b2, w3t, b3)

    q = q_tiles.reshape(-1)[:B].reshape(B, 1)
    return q, hidden_state


def init_params(key, input_shape, hidden_dim):
    """Deterministic synthetic parameters (shapes match the PyTorch module, transposed)."""
    k1, k2, k3 = jax.random.split(key, 3)
    w1 = jax.random.normal(k1, (input_shape, hidden_dim), jnp.float32) * 0.1
    b1 = jnp.zeros((1, hidden_dim), jnp.float32)
    w2 = jax.random.normal(k2, (hidden_dim, hidden_dim), jnp.float32) * 0.1
    b2 = jnp.zeros((1, hidden_dim), jnp.float32)
    w3 = jax.random.normal(k3, (hidden_dim, 1), jnp.float32) * 0.1
    b3 = jnp.zeros((1, 1), jnp.float32)
    return (w1, b1, w2, b2, w3, b3)


def _reference(x_state, x_act, params):
    w1, b1, w2, b2, w3, b3 = params
    x = jnp.concatenate([x_state, x_act], axis=-1)
    h1 = jnp.maximum(x @ w1 + b1, 0.0)
    h2 = jnp.maximum(h1 @ w2 + b2, 0.0)
    return h2 @ w3 + b3


if __name__ == "__main__":
    # Small shapes consistent with the module's forward.
    n_agents = 3
    n_actions = 4
    state_dim = 16                                   # scheme["state"]["vshape"]
    hidden_dim = 32                                  # args.rnn_hidden_dim
    input_shape = state_dim + n_actions * n_agents   # 28
    batch = 8                                        # flattened (bs * t * ...) rows

    key = jax.random.PRNGKey(0)
    k_in, k_act, k_par = jax.random.split(key, 3)

    inputs = jax.random.normal(k_in, (batch, state_dim), jnp.float32)
    actions = jax.random.normal(k_act, (batch, n_agents, n_actions), jnp.float32)
    params = init_params(k_par, input_shape, hidden_dim)

    q, h = maddpg_critic_forward(
        inputs, actions, params,
        input_shape=input_shape, n_actions=n_actions, n_agents=n_agents,
        hidden_state=None,
    )
    jax.block_until_ready(q)
    assert q.shape == (batch, 1)

    # Loose-tolerance check vs. an f32 JAX reference (kernel uses bf16 MXU inputs).
    q_ref = _reference(inputs.reshape(-1, state_dim),
                       actions.reshape(-1, n_actions * n_agents), params)
    assert jnp.allclose(q, q_ref, atol=5e-2, rtol=5e-2), (q, q_ref)

    print("KERNEL_OK")
</pallas_src>

<mosaic_0001>
module attributes {stable_mosaic.version = 11 : i64} {
  func.func @_critic_kernel(%arg0: i32, %arg1: memref<16x16xbf16, #tpu.memory_space<vmem>>, %arg2: memref<16x12xbf16, #tpu.memory_space<vmem>>, %arg3: memref<16x32xbf16, #tpu.memory_space<vmem>>, %arg4: memref<12x32xbf16, #tpu.memory_space<vmem>>, %arg5: memref<1x32xf32, #tpu.memory_space<vmem>>, %arg6: memref<32x32xbf16, #tpu.memory_space<vmem>>, %arg7: memref<1x32xf32, #tpu.memory_space<vmem>>, %arg8: memref<1x32xbf16, #tpu.memory_space<vmem>>, %arg9: memref<1x1xf32, #tpu.memory_space<vmem>>, %arg10: memref<1x1x16xf32, #tpu.memory_space<vmem>>) attributes {dimension_semantics = [#tpu.dimension_semantics<parallel>], iteration_bounds = array<i64: 1>, scalar_prefetch = 0 : i64, scratch_operands = 0 : i64, tpu.core_type = #tpu.core_type<tc>, window_params = [{transform_indices = @transform_0, window_bounds = array<i64: 16, 16>}, {transform_indices = @transform_1, window_bounds = array<i64: 16, 12>}, {pipeline_mode = #tpu.pipeline_mode<synchronous>, transform_indices = @transform_2, window_bounds = array<i64: 16, 32>}, {pipeline_mode = #tpu.pipeline_mode<synchronous>, transform_indices = @transform_3, window_bounds = array<i64: 12, 32>}, {pipeline_mode = #tpu.pipeline_mode<synchronous>, transform_indices = @transform_4, window_bounds = array<i64: 1, 32>}, {pipeline_mode = #tpu.pipeline_mode<synchronous>, transform_indices = @transform_5, window_bounds = array<i64: 32, 32>}, {pipeline_mode = #tpu.pipeline_mode<synchronous>, transform_indices = @transform_6, window_bounds = array<i64: 1, 32>}, {pipeline_mode = #tpu.pipeline_mode<synchronous>, transform_indices = @transform_7, window_bounds = array<i64: 1, 32>}, {pipeline_mode = #tpu.pipeline_mode<synchronous>, transform_indices = @transform_8, window_bounds = array<i64: 1, 1>}, {transform_indices = @transform_9, window_bounds = array<i64: 1, 1, 16>}]} {
    %c0 = arith.constant 0 : index
    %c0_0 = arith.constant 0 : index
    %0 = vector.load %arg1[%c0, %c0_0] : memref<16x16xbf16, #tpu.memory_space<vmem>>, vector<16x16xbf16>
    %c0_1 = arith.constant 0 : index
    %c0_2 = arith.constant 0 : index
    %1 = vector.load %arg3[%c0_1, %c0_2] : memref<16x32xbf16, #tpu.memory_space<vmem>>, vector<16x32xbf16>
    %cst = arith.constant dense<0.000000e+00> : vector<16x32xf32>
    %2 = tpu.matmul %0, %1, %cst {dimension_numbers = #tpu.dot_dimension_numbers<[1], [0], [0], [1], [0, 0, 1, 1], [], []>} : vector<16x16xbf16>, vector<16x32xbf16>, vector<16x32xf32> -> vector<16x32xf32>
    %c0_3 = arith.constant 0 : index
    %c0_4 = arith.constant 0 : index
    %3 = vector.load %arg2[%c0_3, %c0_4] : memref<16x12xbf16, #tpu.memory_space<vmem>>, vector<16x12xbf16>
    %c0_5 = arith.constant 0 : index
    %c0_6 = arith.constant 0 : index
    %4 = vector.load %arg4[%c0_5, %c0_6] : memref<12x32xbf16, #tpu.memory_space<vmem>>, vector<12x32xbf16>
    %cst_7 = arith.constant dense<0.000000e+00> : vector<16x32xf32>
    %5 = tpu.matmul %3, %4, %cst_7 {dimension_numbers = #tpu.dot_dimension_numbers<[1], [0], [0], [1], [0, 0, 1, 1], [], []>} : vector<16x12xbf16>, vector<12x32xbf16>, vector<16x32xf32> -> vector<16x32xf32>
    %6 = arith.addf %2, %5 : vector<16x32xf32>
    %c0_8 = arith.constant 0 : index
    %c0_9 = arith.constant 0 : index
    %7 = vector.load %arg5[%c0_8, %c0_9] : memref<1x32xf32, #tpu.memory_space<vmem>>, vector<1x32xf32>
    %8 = vector.broadcast %7 : vector<1x32xf32> to vector<16x32xf32>
    %9 = arith.addf %6, %8 : vector<16x32xf32>
    %cst_10 = arith.constant 0.000000e+00 : f32
    %10 = vector.broadcast %cst_10 : f32 to vector<16x32xf32>
    %11 = arith.maximumf %9, %10 : vector<16x32xf32>
    %12 = arith.truncf %11 : vector<16x32xf32> to vector<16x32xbf16>
    %c0_11 = arith.constant 0 : index
    %c0_12 = arith.constant 0 : index
    %13 = vector.load %arg6[%c0_11, %c0_12] : memref<32x32xbf16, #tpu.memory_space<vmem>>, vector<32x32xbf16>
    %cst_13 = arith.constant dense<0.000000e+00> : vector<16x32xf32>
    %14 = tpu.matmul %12, %13, %cst_13 {dimension_numbers = #tpu.dot_dimension_numbers<[1], [0], [0], [1], [0, 0, 1, 1], [], []>} : vector<16x32xbf16>, vector<32x32xbf16>, vector<16x32xf32> -> vector<16x32xf32>
    %c0_14 = arith.constant 0 : index
    %c0_15 = arith.constant 0 : index
    %15 = vector.load %arg7[%c0_14, %c0_15] : memref<1x32xf32, #tpu.memory_space<vmem>>, vector<1x32xf32>
    %16 = vector.broadcast %15 : vector<1x32xf32> to vector<16x32xf32>
    %17 = arith.addf %14, %16 : vector<16x32xf32>
    %cst_16 = arith.constant 0.000000e+00 : f32
    %18 = vector.broadcast %cst_16 : f32 to vector<16x32xf32>
    %19 = arith.maximumf %17, %18 : vector<16x32xf32>
    %c0_17 = arith.constant 0 : index
    %c0_18 = arith.constant 0 : index
    %20 = vector.load %arg8[%c0_17, %c0_18] : memref<1x32xbf16, #tpu.memory_space<vmem>>, vector<1x32xbf16>
    %21 = arith.truncf %19 : vector<16x32xf32> to vector<16x32xbf16>
    %cst_19 = arith.constant dense<0.000000e+00> : vector<1x16xf32>
    %22 = tpu.matmul %20, %21, %cst_19 {dimension_numbers = #tpu.dot_dimension_numbers<[1], [1], [0], [0], [0, 0, 1, 0], [], []>} : vector<1x32xbf16>, vector<16x32xbf16>, vector<1x16xf32> -> vector<1x16xf32>
    %c0_20 = arith.constant 0 : index
    %c0_21 = arith.constant 0 : index
    %23 = vector.load %arg9[%c0_20, %c0_21] : memref<1x1xf32, #tpu.memory_space<vmem>>, vector<1x1xf32>
    %24 = vector.broadcast %23 : vector<1x1xf32> to vector<1x16xf32>
    %25 = arith.addf %22, %24 : vector<1x16xf32>
    %26 = vector.shape_cast %25 : vector<1x16xf32> to vector<1x1x16xf32>
    %c0_22 = arith.constant 0 : index
    %c0_23 = arith.constant 0 : index
    %c0_24 = arith.constant 0 : index
    %27 = vector.load %arg10[%c0_22, %c0_23, %c0_24] : memref<1x1x16xf32, #tpu.memory_space<vmem>>, vector<1x1x16xf32>
    tpu.vector_store %arg10[%c0_22, %c0_23, %c0_24], %26 {strides = array<i32>} : memref<1x1x16xf32, #tpu.memory_space<vmem>>, vector<1x1x16xf32>,
    return
  }
  func.func @transform_0(%arg0: i32) -> (i32, i32) {
    %c0_i32 = arith.constant 0 : i32
    %c0_i32_0 = arith.constant 0 : i32
    return %arg0, %c0_i32 : i32, i32
  }
  func.func @transform_1(%arg0: i32) -> (i32, i32) {
    %c0_i32 = arith.constant 0 : i32
    %c0_i32_0 = arith.constant 0 : i32
    return %arg0, %c0_i32 : i32, i32
  }
  func.func @transform_2(%arg0: i32) -> (i32, i32) {
    %c0_i32 = arith.constant 0 : i32
    %c0_i32_0 = arith.constant 0 : i32
    %c0_i32_1 = arith.constant 0 : i32
    return %c0_i32, %c0_i32_0 : i32, i32
  }
  func.func @transform_3(%arg0: i32) -> (i32, i32) {
    %c0_i32 = arith.constant 0 : i32
    %c0_i32_0 = arith.constant 0 : i32
    %c0_i32_1 = arith.constant 0 : i32
    return %c0_i32, %c0_i32_0 : i32, i32
  }
  func.func @transform_4(%arg0: i32) -> (i32, i32) {
    %c0_i32 = arith.constant 0 : i32
    %c0_i32_0 = arith.constant 0 : i32
    %c0_i32_1 = arith.constant 0 : i32
    return %c0_i32, %c0_i32_0 : i32, i32
  }
  func.func @transform_5(%arg0: i32) -> (i32, i32) {
    %c0_i32 = arith.constant 0 : i32
    %c0_i32_0 = arith.constant 0 : i32
    %c0_i32_1 = arith.constant 0 : i32
    return %c0_i32, %c0_i32_0 : i32, i32
  }
  func.func @transform_6(%arg0: i32) -> (i32, i32) {
    %c0_i32 = arith.constant 0 : i32
    %c0_i32_0 = arith.constant 0 : i32
    %c0_i32_1 = arith.constant 0 : i32
    return %c0_i32, %c0_i32_0 : i32, i32
  }
  func.func @transform_7(%arg0: i32) -> (i32, i32) {
    %c0_i32 = arith.constant 0 : i32
    %c0_i32_0 = arith.constant 0 : i32
    %c0_i32_1 = arith.constant 0 : i32
    return %c0_i32, %c0_i32_0 : i32, i32
  }
  func.func @transform_8(%arg0: i32) -> (i32, i32) {
    %c0_i32 = arith.constant 0 : i32
    %c0_i32_0 = arith.constant 0 : i32
    %c0_i32_1 = arith.constant 0 : i32
    return %c0_i32, %c0_i32_0 : i32, i32
  }
  func.func @transform_9(%arg0: i32) -> (i32, i32, i32) {
    %c0_i32 = arith.constant 0 : i32
    %c0_i32_0 = arith.constant 0 : i32
    %c0_i32_1 = arith.constant 0 : i32
    return %arg0, %c0_i32, %c0_i32_0 : i32, i32, i32
  }
}

</mosaic_0001>

<bundles_post_ra>
// kernel: tpu_custom_call.1
= control target key start
LH: loop header
LB: loop body
LE: loop exit
PB: predicated region body
PF: predicated region fallthrough
CT: control target
= control target key end

     0   :  { %s726_s0 = inlined_call_operand.hbm [shape: bf16[16,16], index: 0, kind: input, shape index: {}]   ;;  %s727_s1 = inlined_call_operand.hbm [shape: bf16[16,12], index: 1, kind: input, shape index: {}]   ;;  %s728_s2 = inlined_call_operand.hbm [shape: bf16[16,32], index: 2, kind: input, shape index: {}]   ;;  %s729_s3 = inlined_call_operand.hbm [shape: bf16[12,32], index: 3, kind: input, shape index: {}]   ;;  %s730_s4 = inlined_call_operand.vmem [shape: f32[1,32], index: 4, kind: input, shape index: {}]   ;;  %s731_s5 = inlined_call_operand.vmem [shape: bf16[32,32], index: 5, kind: input, shape index: {}]   ;;  %s732_s6 = inlined_call_operand.vmem [shape: f32[1,32], index: 6, kind: input, shape index: {}]   ;;  %s733_s7 = inlined_call_operand.vmem [shape: bf16[1,32], index: 7, kind: input, shape index: {}]   ;;  %s734_s8 = inlined_call_operand.<no memory space> [shape: f32[1,1], index: 8, kind: input, shape index: {}]   ;;  %s735_s9 = inlined_call_operand.hbm [shape: f32[1,1,16], index: 9, kind: output, shape index: {}]  }
   0x1   :  { %v14_v0 = vstv %s734_s8 }
   0x2   :  { %15 = vst [vmem:[#allocation2] sm:$0x1] %v14_v0 }
   0x3   :  { %16 = vsyncpa [#allocation4], 0 }
   0x4   :  { %17 = vsyncpa [#allocation7], 0 }
   0x5   :  { %18 = vsyncpa [#allocation10], 0 }
   0x6   :  { %19 = vsyncpa [#allocation5], 0  ;;  %s555_s11 = smov [#allocation6]   ;;  %s556_s13 = smov [#allocation3]  }
   0x7   :  { %s37_s12 = sshll.u32 %s555_s11, 4  ;;  %s25_s14 = sshll.u32 %s556_s13, 4  ;;  %s38_s12 = int_to_ptr.vmem [resolvable:$true] %s37_s12  ;;  %s618_s14 = int_to_ptr.vmem [resolvable:$true] %s25_s14 }
   0x8   :  { %s437_s17 = scalar_lea.hbm %s727_s1, 128 }
   0x9   :  { %p438_p0 = scmp.ne.s32.totalorder %s727_s1, %s437_s17  ;;  %p441_p1 = scmp.lt.u32.totalorder %s437_s17, %s727_s1 }
   0xb   :  { %p443_p2 = pnand %p441_p1, %p438_p0 }
   0xd   :  { %446 = shalt.err (!%p443_p2)
}
   0xe   :  { %s447_s21 = scalar_lea.vmem %s38_s12, 128  ;;  %p452_p4 = scmp.lt.s32.totalorder %s38_s12, %s38_s12 }
   0xf   :  { %p448_p3 = scmp.ne.s32.totalorder %s38_s12, %s447_s21  ;;  %p453_p5 = scmp.lt.s32.totalorder %s447_s21, %s447_s21 }
  0x11   :  { %p454_p6 = por %p453_p5, %p452_p4 }
  0x13   :  { %p455_p7 = pnand %p454_p6, %p448_p3 }
  0x15   :  { %458 = shalt.err (!%p455_p7)
}
  0x16   :  { %s557_s22 = smov 64   ;;  %s558_s23 = smov 4  }
  0x17   :  { %43 = dma.hbm_to_vmem [thread:$0]  %s727_s1, 128, %s38_s12, [#allocation7], %s557_s22, %s557_s22, %s558_s23  }
  0x18   :  { %s459_s28 = scalar_lea.hbm %s726_s0, 128 }
  0x19   :  { %p460_p8 = scmp.ne.s32.totalorder %s726_s0, %s459_s28  ;;  %p463_p9 = scmp.lt.u32.totalorder %s459_s28, %s726_s0 }
  0x1b   :  { %p465_p10 = pnand %p463_p9, %p460_p8 }
  0x1d   :  { %468 = shalt.err (!%p465_p10)
}
  0x1e   :  { %s469_s13 = scalar_lea.vmem %s618_s14, 128  ;;  %p474_p12 = scmp.lt.s32.totalorder %s618_s14, %s618_s14 }
  0x1f   :  { %p470_p11 = scmp.ne.s32.totalorder %s618_s14, %s469_s13  ;;  %p475_p13 = scmp.lt.s32.totalorder %s469_s13, %s469_s13 }
  0x21   :  { %p476_p0 = por %p475_p13, %p474_p12 }
  0x23   :  { %p477_p1 = pnand %p476_p0, %p470_p11 }
  0x25   :  { %480 = shalt.err (!%p477_p1)
}
  0x26   :  { %31 = dma.hbm_to_vmem [thread:$0]  %s726_s0, 128, %s618_s14, [#allocation4], %s557_s22, %s557_s22, %s558_s23  }
  0x27   :  { %s559_s15 = smov [#allocation8]   ;;  %s560_s17 = smov [#allocation9]  }
  0x28   :  { %s49_s16 = sshll.u32 %s559_s15, 4  ;;  %s61_s18 = sshll.u32 %s560_s17, 4  ;;  %s50_s16 = int_to_ptr.vmem [resolvable:$true] %s49_s16  ;;  %s655_s18 = int_to_ptr.vmem [resolvable:$true] %s61_s18 }
  0x29   :  { %s481_s20 = scalar_lea.hbm %s728_s2, 128 }
  0x2a   :  { %p482_p2 = scmp.ne.s32.totalorder %s728_s2, %s481_s20  ;;  %p485_p3 = scmp.lt.u32.totalorder %s481_s20, %s728_s2 }
  0x2c   :  { %p487_p4 = pnand %p485_p3, %p482_p2 }
  0x2e   :  { %490 = shalt.err (!%p487_p4)
}
  0x2f   :  { %s491_s0 = scalar_lea.vmem %s50_s16, 128  ;;  %p496_p6 = scmp.lt.s32.totalorder %s50_s16, %s50_s16 }
  0x30   :  { %p492_p5 = scmp.ne.s32.totalorder %s50_s16, %s491_s0  ;;  %p497_p7 = scmp.lt.s32.totalorder %s491_s0, %s491_s0 }
  0x32   :  { %p498_p8 = por %p497_p7, %p496_p6 }
  0x34   :  { %p499_p9 = pnand %p498_p8, %p492_p5 }
  0x36   :  { %502 = shalt.err (!%p499_p9)
}
  0x37   :  { %55 = dma.hbm_to_vmem [thread:$0]  %s728_s2, 128, %s50_s16, [#allocation7], %s557_s22, %s557_s22, %s558_s23  }
  0x38   :  { %s503_s30 = scalar_lea.hbm %s729_s3, 128 }
  0x39   :  { %p504_p10 = scmp.ne.s32.totalorder %s729_s3, %s503_s30  ;;  %p507_p11 = scmp.lt.u32.totalorder %s503_s30, %s729_s3 }
  0x3b   :  { %p509_p12 = pnand %p507_p11, %p504_p10 }
  0x3d   :  { %512 = shalt.err (!%p509_p12)
}
  0x3e   :  { %s513_s12 = scalar_lea.vmem %s655_s18, 128  ;;  %p518_p0 = scmp.lt.s32.totalorder %s655_s18, %s655_s18 }
  0x3f   :  { %p514_p13 = scmp.ne.s32.totalorder %s655_s18, %s513_s12  ;;  %p519_p1 = scmp.lt.s32.totalorder %s513_s12, %s513_s12 }
  0x41   :  { %p520_p2 = por %p519_p1, %p518_p0 }
  0x43   :  { %p521_p3 = pnand %p520_p2, %p514_p13 }
  0x45   :  { %524 = shalt.err (!%p521_p3)
}
  0x46   :  { %67 = dma.hbm_to_vmem [thread:$0]  %s729_s3, 128, %s655_s18, [#allocation10], %s557_s22, %s557_s22, %s558_s23  }
  0x47   :  { %547 = dma.done.wait [#allocation4], 128  }
  0x48   :  { %548 = vsyncadd [#allocation4], 4294967168 }
  0x49   :  { %549 = dma.done.wait [#allocation7], 256  }
  0x4a   :  { %550 = vsyncadd [#allocation7], 4294967040 }
  0x4b   :  { %551 = dma.done.wait [#allocation10], 128  }
  0x4c   :  { %552 = vsyncadd [#allocation10], 4294967168  ;;  %v561_v1 = vmov 0.0   ;;  %vm562_vm0 = vmmov 0   ;;  %vm113_vm1 = vcmask 1045504   ;;  %v431_v2 = vld [vmem:[#allocation8] sm:$0xff]   ;;  %v304_v39 = vlaneseq }
  0x4d   :  { %400 = vmatprep.subr.bf16.mxu1 %v561_v1  ;;  %394 = vmatprep.subr.bf16.mxu0 %v561_v1  ;;  %vm169_vm2 = vcmask 130048   ;;  %v432_v3 = vld [vmem:[#allocation9] sm:$0x3f]   ;;  %v433_v4 = vld [vmem:[#allocation3] sm:$0xff]   ;;  %vm109_vm3 = vcmask 97280   ;;  %v434_v6 = vld [vmem:[#allocation6] sm:$0xff]  }
  0x4e   :  { %402 = vmatprep.mubr.msk.bf16.mxu1 %vm562_vm0, %v561_v1  ;;  %396 = vmatprep.mubr.msk.bf16.mxu0 %vm562_vm0, %v561_v1  ;;  %v115_v5 = vsel %vm113_vm1, %v432_v3, 0  ;;  %v435_v7 = vld [vmem:[%s731_s5] sm:$0xff]   ;;  %v436_v8 = vld [vmem:[%s731_s5 + $0x8] sm:$0xff]   ;;  %vm249_vm4 = vcmask 261120   ;;  %v563_v26 = vmov 0   ;;  %v305_v40 = vshrl.u32 %v304_v39, 7 }
  0x4f   :  { %401 = vmatpush3.bf16.msra.mxu1 %v431_v2  ;;  %395 = vmatpush3.bf16.msra.mxu0 %v115_v5  ;;  %v379_v12 = vld [vmem:[%s730_s4] ss:$0 sm:$0xff]  ;;  %vm354_vm5 = vcmask 122880  }
  0x50   :  { %414 = vmatprep.subr.bf16.mxu1 %v561_v1  ;;  %406 = vmatprep.subr.bf16.mxu0 %v561_v1  ;;  %v298_v25 = vld [vmem:[#allocation2] sm:$0x1]  ;;  %v306_v41 = vsub.s32 0, %v305_v40 }
  0x51   :  { %430 = vset.pattern.permute.xlu0 %v563_v26  ;;  %v380_v27 = vld [vmem:[%s732_s6] ss:$0 sm:$0xff]  ;;  %s564_s6 = smov [#allocation11]  }
  0x52   :  { %403 = vmatmul.mubr.msk.bf16.vlgmr.msra.gmra.mrb[0].mxu1 %vm169_vm2, %v433_v4  ;;  %397 = vmatmul.mubr.msk.bf16.vlgmr.msra.gmra.mrb[0].mxu0 %vm109_vm3, %v434_v6  ;;  %v296_v38 = vld [vmem:[%s733_s7] sm:$0x1]  ;;  %s362_s20 = sshll.u32 %s564_s6, 4  ;;  %s363_s20 = int_to_ptr.vmem [resolvable:$true] %s362_s20 }
  0x53   :  { %416 = vmatprep.mubr.msk.bf16.mxu1 %vm562_vm0, %v561_v1  ;;  %410 = vmatprep.mubr.msk.bf16.mxu0 %vm562_vm0, %v561_v1  ;;  %s525_s21 = scalar_lea.vmem %s363_s20, 16  ;;  %s529_s7 = scalar_lea.vmem %s363_s20, 32 }
  0x54   :  { %407 = vmatpush3.bf16.msra.mxu0 %v435_v7  ;;  %301 = vperm.xlu0 %430, %v298_v25   ;;  %p526_p4 = scmp.ne.s32.totalorder %s363_s20, %s525_s21  ;;  %p530_p5 = scmp.lt.s32.totalorder %s363_s20, %s363_s20 }
  0x55   :  { %408 = vmatprep.subr.bf16.mxu0 %v561_v1  ;;  %p531_p6 = scmp.lt.s32.totalorder %s529_s7, %s525_s21 }
  0x57   :  { %p532_p7 = por %p531_p6, %p530_p5 }
  0x58   :  { %409 = vmatpush3.bf16.msra.mxu0 %v436_v8 }
  0x59   :  { %p533_p8 = pnand %p532_p7, %p526_p4 }
  0xd3   :  { %v302_v42 = vpop.permute.xlu0 %301 }
  0xd4   :  { %v307_v43 = vrot.slane %v302_v42, %v306_v41 }
 0x125   :  { %v207_v9 = vpop.f32.mrb[0].mxu1  ;;  %v151_v11 = vpop.f32.mrb[0].mxu0 }
 0x126   :  { %v404_v10 = vpop.f32.mrb[1].mxu1  ;;  %v208_v14 = vadd.f32 %v207_v9, %v151_v11  ;;  %v398_v15 = vpop.f32.mrb[1].mxu0 }
 0x127   :  { %v210_v13 = vpop.f32.mrb[2].mxu1  ;;  %v154_v17 = vpop.f32.mrb[2].mxu0 }
 0x128   :  { %v405_v16 = vpop.f32.mrb[3].mxu1  ;;  %v221_v18 = vadd.f32 %v379_v12, %v208_v14  ;;  %v211_v19 = vadd.f32 %v210_v13, %v154_v17  ;;  %v399_v20 = vpop.f32.mrb[3].mxu0 }
 0x12a   :  { %v222_v21 = vadd.f32 %v379_v12, %v211_v19  ;;  %v223_v22 = vmax.f32 %v221_v18, 0.0 }
 0x12c   :  { %v224_v23 = vmax.f32 %v222_v21, 0.0 }
 0x12e   :  { %v225_v24 = vpack.c.bf16 %v224_v23, %v223_v22 }
 0x130   :  { %411 = vmatmul.mubr.msk.bf16.vlgmr.msra.gmra.mrb[4].mxu0 %vm249_vm4, %v225_v24 }
 0x203   :  { %v287_v28 = vpop.f32.mrb[4].mxu0 }
 0x204   :  { %v288_v29 = vadd.f32 %v380_v27, %v287_v28  ;;  %v412_v30 = vpop.f32.mrb[5].mxu0 }
 0x205   :  { %v290_v31 = vpop.f32.mrb[6].mxu0 }
 0x206   :  { %v291_v32 = vadd.f32 %v380_v27, %v290_v31  ;;  %v413_v33 = vpop.f32.mrb[7].mxu0  ;;  %v294_v34 = vmax.f32 %v288_v29, 0.0 }
 0x208   :  { %v295_v35 = vmax.f32 %v291_v32, 0.0 }
 0x20a   :  { %v297_v36 = vpack.c.bf16 %v295_v35, %v294_v34 }
 0x20c   :  { %v312_v37 = vsel %vm249_vm4, %v297_v36, 0 }
 0x20d   :  { %415 = vmatpush3.bf16.xpose.msra.mxu1 %v312_v37 }
 0x214   :  { %417 = vmatmul.mubr.msk.bf16.vlgmr.msra.gmra.mrb[4].mxu1 %vm249_vm4, %v296_v38 }
 0x2e7   :  { %v348_v44 = vpop.f32.mrb[4].mxu1 }
 0x2e8   :  { %v349_v45 = vadd.f32 %v348_v44, %v307_v43  ;;  %v418_v46 = vpop.f32.mrb[5].mxu1 }
 0x2e9   :  { %v351_v47 = vpop.f32.mrb[6].mxu1 }
 0x2ea   :  { %v419_v48 = vpop.f32.mrb[7].mxu1  ;;  %355 = vst.msk [vmem:[#allocation11] sm:$0x1] %vm354_vm5, %v349_v45 }
 0x2eb   :  { %536 = shalt.err (!%p533_p8)
}
 0x2ec   :  { %s537_s26 = scalar_lea.hbm %s735_s9, 16 }
 0x2ed   :  { %p538_p9 = scmp.ne.s32.totalorder %s735_s9, %s537_s26  ;;  %p541_p10 = scmp.lt.u32.totalorder %s537_s26, %s735_s9 }
 0x2ef   :  { %p543_p11 = pnand %p541_p10, %p538_p9 }
 0x2f1   :  { %546 = shalt.err (!%p543_p11)
}
 0x2f2   :  { %365 = dma.vmem_to_hbm [thread:$0]  %s363_s20, 16, %s735_s9, [#allocation5]  }
 0x2f3   :  { %553 = dma.done.wait [#allocation5], 16  }
 0x2f4   :  { %554 = vsyncadd [#allocation5], 4294967280 }
 0x2f5   :  { %369 = vsyncpa [#allocation4], 1 }
 0x2f6   :  { %370 = vsyncpa [#allocation7], 1 }
 0x2f7   :  { %371 = vsyncpa [#allocation10], 1 }
 0x2f8   :  { %372 = vsyncpa [#allocation5], 1 }

</bundles_post_ra>
